<compile_context>
chip_gen: v5e
topology: v5e:2x2
jax: 0.10.0
libtpu: 0.0.40
codegen_flags: <defaults>
</compile_context>

<pallas_src>
import jax
import jax.numpy as jnp
from jax.experimental import pallas as pl
from jax.experimental.pallas import tpu as pltpu

NUM_CODEWORDS = 8
LANES = 128
DEFAULT_BLOCK_ROWS = 2048      # (2048, 128) f32 block = 1 MiB per stream


def _round_up(n, m):
    return ((n + m - 1) // m) * m


def vq_kernel(cw_ref, x_ref, idx_ref, dist_ref):
    """cw_ref: SMEM (K,) codewords; x_ref: VMEM (BR, 128) tile of the input."""
    x = x_ref[...]
    k_total = cw_ref.shape[0]

    # Hoist the K scalar loads; each codeword is splat-broadcast once per tile.
    cws = [cw_ref[k] for k in range(k_total)]

    best_d = jnp.abs(x - cws[0])
    best_i = jnp.zeros(x.shape, dtype=jnp.int32)
    # K is small and static -> fully unrolled elementwise chain on the VPU.
    for k in range(1, k_total):
        d = jnp.abs(x - cws[k])
        take = d < best_d                      # strict '<': first index wins on ties
        best_d = jnp.where(take, d, best_d)
        best_i = jnp.where(take, jnp.int32(k), best_i)

    idx_ref[...] = best_i.astype(jnp.int8)     # int8 store cuts HBM write traffic
    dist_ref[...] = best_d


def vq_forward(x, codewords, block_rows=DEFAULT_BLOCK_ROWS):
    """x: (N,) float32 (any N); codewords: (K,) float32.

    Returns (indices int8 (N,), distances float32 (N,)).
    """
    n = x.shape[0]
    rows_needed = pl.cdiv(n, LANES)
    # Block rows: multiple of 32 (native int8 (32,128) sublane tiling; also a
    # multiple of 8 for f32) and no bigger than the rounded-up input needs.
    br = min(block_rows, _round_up(rows_needed, 32))
    padded_rows = _round_up(rows_needed, br)
    padded_n = padded_rows * LANES

    x_pad = x if padded_n == n else jnp.pad(x, (0, padded_n - n))
    x2 = x_pad.reshape(padded_rows, LANES)

    grid = (padded_rows // br,)   # "parallel" axis -> shardable over v7x's 2 TCs

    idx2, dist2 = pl.pallas_call(
        vq_kernel,
        out_shape=(
            jax.ShapeDtypeStruct((padded_rows, LANES), jnp.int8),
            jax.ShapeDtypeStruct((padded_rows, LANES), x.dtype),
        ),
        grid_spec=pltpu.PrefetchScalarGridSpec(
            num_scalar_prefetch=0,
            grid=grid,
            in_specs=[
                pl.BlockSpec(memory_space=pltpu.MemorySpace.SMEM),   # codewords (K,)
                pl.BlockSpec((br, LANES), lambda i: (i, 0)),         # x tile
            ],
            out_specs=[
                pl.BlockSpec((br, LANES), lambda i: (i, 0)),         # indices (int8)
                pl.BlockSpec((br, LANES), lambda i: (i, 0)),         # distances (f32)
            ],
        ),
        compiler_params=pltpu.CompilerParams(
            dimension_semantics=("parallel",),
        ),
    )(codewords, x2)

    idx = idx2.reshape(padded_n)[:n]
    dist = dist2.reshape(padded_n)[:n]
    return idx, dist


def vq_reference(x, codewords):
    d = jnp.abs(x[:, None] - codewords[None, :])
    idx = jnp.argmin(d, axis=1).astype(jnp.int32)
    dist = jnp.abs(x - codewords[idx])
    return idx, dist


if __name__ == "__main__":
    key = jax.random.PRNGKey(0)
    k_cw, k_x = jax.random.split(key)

    # Deterministic "parameter" init (matches nn.Parameter(torch.randn(K)) shape).
    codewords = jax.random.normal(k_cw, (NUM_CODEWORDS,), dtype=jnp.float32)
    # 1-D input, deliberately NOT a multiple of the tile size to exercise padding.
    x = jax.random.normal(k_x, (1000,), dtype=jnp.float32)

    idx, dist = vq_forward(x, codewords)
    jax.block_until_ready((idx, dist))

    ref_idx, ref_dist = vq_reference(x, codewords)
    assert idx.dtype == jnp.int8
    assert jnp.array_equal(idx.astype(jnp.int32), ref_idx), "index mismatch vs reference"
    assert jnp.allclose(dist, ref_dist, atol=1e-6), "distance mismatch vs reference"

    print("KERNEL_OK")
</pallas_src>

<mosaic_0001>
module attributes {stable_mosaic.version = 11 : i64} {
  func.func @vq_kernel(%arg0: i32, %arg1: memref<8xf32, #tpu.memory_space<smem>>, %arg2: memref<32x128xf32, #tpu.memory_space<vmem>>, %arg3: memref<32x128xi8, #tpu.memory_space<vmem>>, %arg4: memref<32x128xf32, #tpu.memory_space<vmem>>) attributes {dimension_semantics = [#tpu.dimension_semantics<parallel>], iteration_bounds = array<i64: 1>, scalar_prefetch = 0 : i64, scratch_operands = 0 : i64, tpu.core_type = #tpu.core_type<tc>, window_params = [{transform_indices = @transform_0, window_bounds = array<i64: 8>}, {transform_indices = @transform_1, window_bounds = array<i64: 32, 128>}, {transform_indices = @transform_2, window_bounds = array<i64: 32, 128>}, {transform_indices = @transform_3, window_bounds = array<i64: 32, 128>}]} {
    %c0 = arith.constant 0 : index
    %c0_0 = arith.constant 0 : index
    %0 = vector.load %arg2[%c0, %c0_0] : memref<32x128xf32, #tpu.memory_space<vmem>>, vector<32x128xf32>
    %c0_1 = arith.constant 0 : index
    %1 = memref.load %arg1[%c0_1] : memref<8xf32, #tpu.memory_space<smem>>
    %c1 = arith.constant 1 : index
    %2 = memref.load %arg1[%c1] : memref<8xf32, #tpu.memory_space<smem>>
    %c2 = arith.constant 2 : index
    %3 = memref.load %arg1[%c2] : memref<8xf32, #tpu.memory_space<smem>>
    %c3 = arith.constant 3 : index
    %4 = memref.load %arg1[%c3] : memref<8xf32, #tpu.memory_space<smem>>
    %c4 = arith.constant 4 : index
    %5 = memref.load %arg1[%c4] : memref<8xf32, #tpu.memory_space<smem>>
    %c5 = arith.constant 5 : index
    %6 = memref.load %arg1[%c5] : memref<8xf32, #tpu.memory_space<smem>>
    %c6 = arith.constant 6 : index
    %7 = memref.load %arg1[%c6] : memref<8xf32, #tpu.memory_space<smem>>
    %c7 = arith.constant 7 : index
    %8 = memref.load %arg1[%c7] : memref<8xf32, #tpu.memory_space<smem>>
    %9 = vector.broadcast %1 : f32 to vector<32x128xf32>
    %10 = arith.subf %0, %9 : vector<32x128xf32>
    %11 = math.absf %10 : vector<32x128xf32>
    %c0_i32 = arith.constant 0 : i32
    %12 = vector.broadcast %c0_i32 : i32 to vector<32x128xi32>
    %13 = vector.broadcast %2 : f32 to vector<32x128xf32>
    %14 = arith.subf %0, %13 : vector<32x128xf32>
    %15 = math.absf %14 : vector<32x128xf32>
    %16 = arith.cmpf olt, %15, %11 : vector<32x128xf32>
    %17 = arith.select %16, %15, %11 : vector<32x128xi1>, vector<32x128xf32>
    %c1_i32 = arith.constant 1 : i32
    %18 = vector.broadcast %c1_i32 : i32 to vector<32x128xi32>
    %19 = arith.select %16, %18, %12 : vector<32x128xi1>, vector<32x128xi32>
    %20 = vector.broadcast %3 : f32 to vector<32x128xf32>
    %21 = arith.subf %0, %20 : vector<32x128xf32>
    %22 = math.absf %21 : vector<32x128xf32>
    %23 = arith.cmpf olt, %22, %17 : vector<32x128xf32>
    %24 = arith.select %23, %22, %17 : vector<32x128xi1>, vector<32x128xf32>
    %c2_i32 = arith.constant 2 : i32
    %25 = vector.broadcast %c2_i32 : i32 to vector<32x128xi32>
    %26 = arith.select %23, %25, %19 : vector<32x128xi1>, vector<32x128xi32>
    %27 = vector.broadcast %4 : f32 to vector<32x128xf32>
    %28 = arith.subf %0, %27 : vector<32x128xf32>
    %29 = math.absf %28 : vector<32x128xf32>
    %30 = arith.cmpf olt, %29, %24 : vector<32x128xf32>
    %31 = arith.select %30, %29, %24 : vector<32x128xi1>, vector<32x128xf32>
    %c3_i32 = arith.constant 3 : i32
    %32 = vector.broadcast %c3_i32 : i32 to vector<32x128xi32>
    %33 = arith.select %30, %32, %26 : vector<32x128xi1>, vector<32x128xi32>
    %34 = vector.broadcast %5 : f32 to vector<32x128xf32>
    %35 = arith.subf %0, %34 : vector<32x128xf32>
    %36 = math.absf %35 : vector<32x128xf32>
    %37 = arith.cmpf olt, %36, %31 : vector<32x128xf32>
    %38 = arith.select %37, %36, %31 : vector<32x128xi1>, vector<32x128xf32>
    %c4_i32 = arith.constant 4 : i32
    %39 = vector.broadcast %c4_i32 : i32 to vector<32x128xi32>
    %40 = arith.select %37, %39, %33 : vector<32x128xi1>, vector<32x128xi32>
    %41 = vector.broadcast %6 : f32 to vector<32x128xf32>
    %42 = arith.subf %0, %41 : vector<32x128xf32>
    %43 = math.absf %42 : vector<32x128xf32>
    %44 = arith.cmpf olt, %43, %38 : vector<32x128xf32>
    %45 = arith.select %44, %43, %38 : vector<32x128xi1>, vector<32x128xf32>
    %c5_i32 = arith.constant 5 : i32
    %46 = vector.broadcast %c5_i32 : i32 to vector<32x128xi32>
    %47 = arith.select %44, %46, %40 : vector<32x128xi1>, vector<32x128xi32>
    %48 = vector.broadcast %7 : f32 to vector<32x128xf32>
    %49 = arith.subf %0, %48 : vector<32x128xf32>
    %50 = math.absf %49 : vector<32x128xf32>
    %51 = arith.cmpf olt, %50, %45 : vector<32x128xf32>
    %52 = arith.select %51, %50, %45 : vector<32x128xi1>, vector<32x128xf32>
    %c6_i32 = arith.constant 6 : i32
    %53 = vector.broadcast %c6_i32 : i32 to vector<32x128xi32>
    %54 = arith.select %51, %53, %47 : vector<32x128xi1>, vector<32x128xi32>
    %55 = vector.broadcast %8 : f32 to vector<32x128xf32>
    %56 = arith.subf %0, %55 : vector<32x128xf32>
    %57 = math.absf %56 : vector<32x128xf32>
    %58 = arith.cmpf olt, %57, %52 : vector<32x128xf32>
    %59 = arith.select %58, %57, %52 : vector<32x128xi1>, vector<32x128xf32>
    %c7_i32 = arith.constant 7 : i32
    %60 = vector.broadcast %c7_i32 : i32 to vector<32x128xi32>
    %61 = arith.select %58, %60, %54 : vector<32x128xi1>, vector<32x128xi32>
    %62 = arith.trunci %61 : vector<32x128xi32> to vector<32x128xi8>
    %c0_2 = arith.constant 0 : index
    %c0_3 = arith.constant 0 : index
    %63 = vector.load %arg3[%c0_2, %c0_3] : memref<32x128xi8, #tpu.memory_space<vmem>>, vector<32x128xi8>
    tpu.vector_store %arg3[%c0_2, %c0_3], %62 {strides = array<i32>} : memref<32x128xi8, #tpu.memory_space<vmem>>, vector<32x128xi8>,
    %c0_4 = arith.constant 0 : index
    %c0_5 = arith.constant 0 : index
    %64 = vector.load %arg4[%c0_4, %c0_5] : memref<32x128xf32, #tpu.memory_space<vmem>>, vector<32x128xf32>
    tpu.vector_store %arg4[%c0_4, %c0_5], %59 {strides = array<i32>} : memref<32x128xf32, #tpu.memory_space<vmem>>, vector<32x128xf32>,
    return
  }
  func.func @transform_0(%arg0: i32) -> i32 {
    %c0_i32 = arith.constant 0 : i32
    %c0_i32_0 = arith.constant 0 : i32
    return %c0_i32 : i32
  }
  func.func @transform_1(%arg0: i32) -> (i32, i32) {
    %c0_i32 = arith.constant 0 : i32
    %c0_i32_0 = arith.constant 0 : i32
    return %arg0, %c0_i32 : i32, i32
  }
  func.func @transform_2(%arg0: i32) -> (i32, i32) {
    %c0_i32 = arith.constant 0 : i32
    %c0_i32_0 = arith.constant 0 : i32
    return %arg0, %c0_i32 : i32, i32
  }
  func.func @transform_3(%arg0: i32) -> (i32, i32) {
    %c0_i32 = arith.constant 0 : i32
    %c0_i32_0 = arith.constant 0 : i32
    return %arg0, %c0_i32 : i32, i32
  }
}

</mosaic_0001>

<bundles_post_ra>
// kernel: tpu_custom_call.1
= control target key start
LH: loop header
LB: loop body
LE: loop exit
PB: predicated region body
PF: predicated region fallthrough
CT: control target
= control target key end

     0   :  { %9 = vsyncpa [#allocation5], 0  ;;  %s507_s0 = inlined_call_operand.hbm [shape: f32[8], index: 0, kind: input, shape index: {}]   ;;  %s508_s1 = inlined_call_operand.hbm [shape: f32[32,128], index: 1, kind: input, shape index: {}]   ;;  %s509_s2 = inlined_call_operand.hbm [shape: s8[32,128], index: 2, kind: output, shape index: {0}]   ;;  %s510_s3 = inlined_call_operand.hbm [shape: f32[32,128], index: 3, kind: output, shape index: {1}]  }
   0x1   :  { %10 = vsyncpa [#allocation3], 0 }
   0x2   :  { %11 = vsyncpa [#allocation4], 0 }
   0x3   :  { %12 = vsyncpa [#allocation9], 0  ;;  %s18_s14 = sshll.u32 %s507_s0, 4  ;;  %s26_s17 = sshll.u32 %s508_s1, 4  ;;  %s19_s14 = int_to_ptr.hbm [resolvable:$true] %s18_s14  ;;  %s27_s17 = int_to_ptr.hbm [resolvable:$true] %s26_s17 }
   0x4   :  { %s362_s18 = smov [#allocation2]   ;;  %s363_s19 = smov [#allocation6]  }
   0x5   :  { %21 = dma.hbm_to_smem %s19_s14, 16, %s362_s18, [#allocation5]  }
   0x6   :  { %s28_s20 = sshll.u32 %s363_s19, 4  ;;  %s364_s21 = smov 128   ;;  %s29_s20 = int_to_ptr.vmem [resolvable:$true] %s28_s20 }
   0x7   :  { %s365_s22 = smov 8  }
   0x8   :  { %34 = dma.hbm_to_vmem [thread:$0]  %s27_s17, 512, %s29_s20, [#allocation3], %s364_s21, %s364_s21, %s365_s22  }
   0x9   :  { %354 = dma.done.wait [#allocation5], 16  }
   0xa   :  { %355 = vsyncadd [#allocation5], 4294967280 }
   0xb   :  { %356 = dma.done.wait [#allocation3], 512  }
   0xc   :  { %357 = vsyncadd [#allocation3], 4294966784 }
   0xd   :  { %43 = sfence }
   0xe   :  { %s48_s0 = sld [smem:[#allocation2]]  ;;  %v398_v0 = vld [vmem:[#allocation6] sm:$0xff]  ;;  %v400_v1 = vld [vmem:[#allocation6 + $0x8] sm:$0xff]  ;;  %v402_v2 = vld [vmem:[#allocation6 + $0x10] sm:$0xff]  ;;  %v366_v36 = vmov 0   ;;  %s367_s29 = smov [#allocation8]  }
   0xf   :  { %s256_s23 = sld [smem:[#allocation2 + $0x1]]  ;;  %v404_v3 = vld [vmem:[#allocation6 + $0x18] sm:$0xff]  ;;  %s495_s30 = sshll.u32 %s367_s29, 4  ;;  %s236_s30 = int_to_ptr.vmem [resolvable:$true] %s495_s30 }
  0x10   :  { %s257_s1 = sld [smem:[#allocation2 + $0x2]]  ;;  %s237_s6 = sshll.u32 %s510_s3, 4  ;;  %s238_s6 = int_to_ptr.hbm [resolvable:$true] %s237_s6 }
  0x11   :  { %s410_s24 = sld [smem:[#allocation2 + $0x3]]  ;;  %s368_s7 = smov [#allocation7]  }
  0x12   :  { %s416_s25 = sld [smem:[#allocation2 + $0x4]]  ;;  %s225_s8 = sshll.u32 %s368_s7, 4  ;;  %s226_s8 = int_to_ptr.vmem [resolvable:$true] %s225_s8 }
  0x13   :  { %s426_s26 = sld [smem:[#allocation2 + $0x5]]  ;;  %s227_s11 = sshll.u32 %s509_s2, 4  ;;  %s228_s11 = int_to_ptr.hbm [resolvable:$true] %s227_s11 }
  0x14   :  { %v56_v4 = vstv %s48_s0  ;;  %s429_s27 = sld [smem:[#allocation2 + $0x6]] }
  0x15   :  { %v57_v5 = vsub.f32 %v398_v0, %v56_v4  ;;  %v58_v6 = vsub.f32 %v400_v1, %v56_v4  ;;  %v59_v7 = vsub.f32 %v402_v2, %v56_v4  ;;  %v60_v8 = vsub.f32 %v404_v3, %v56_v4  ;;  %s463_s28 = sld [smem:[#allocation2 + $0x7]] }
  0x16   :  { %v65_v9 = vstv %s256_s23  ;;  %v86_v10 = vstv %s257_s1 }
  0x17   :  { %v61_v11 = vand.u32 2147483647, %v57_v5  ;;  %v62_v12 = vand.u32 2147483647, %v58_v6  ;;  %v63_v13 = vand.u32 2147483647, %v59_v7  ;;  %v66_v14 = vsub.f32 %v398_v0, %v65_v9 }
  0x18   :  { %v64_v15 = vand.u32 2147483647, %v60_v8  ;;  %v67_v16 = vsub.f32 %v400_v1, %v65_v9  ;;  %v68_v17 = vsub.f32 %v402_v2, %v65_v9  ;;  %v69_v18 = vsub.f32 %v404_v3, %v65_v9 }
  0x19   :  { %v70_v19 = vand.u32 2147483647, %v66_v14  ;;  %v87_v20 = vsub.f32 %v398_v0, %v86_v10  ;;  %v88_v21 = vsub.f32 %v400_v1, %v86_v10  ;;  %v89_v22 = vsub.f32 %v402_v2, %v86_v10 }
  0x1a   :  { %v71_v23 = vand.u32 2147483647, %v67_v16  ;;  %v72_v24 = vand.u32 2147483647, %v68_v17  ;;  %v73_v25 = vand.u32 2147483647, %v69_v18  ;;  %v90_v26 = vsub.f32 %v404_v3, %v86_v10 }
  0x1b   :  { %vm74_vm0 = vcmp.lt.f32.partialorder %v70_v19, %v61_v11  ;;  %v91_v27 = vand.u32 2147483647, %v87_v20  ;;  %v92_v28 = vand.u32 2147483647, %v88_v21  ;;  %v93_v29 = vand.u32 2147483647, %v89_v22 }
  0x1c   :  { %vm75_vm1 = vcmp.lt.f32.partialorder %v71_v23, %v62_v12  ;;  %vm76_vm2 = vcmp.lt.f32.partialorder %v72_v24, %v63_v13  ;;  %vm77_vm3 = vcmp.lt.f32.partialorder %v73_v25, %v64_v15  ;;  %v78_v30 = vsel %vm74_vm0, %v70_v19, %v61_v11 }
  0x1d   :  { %v79_v31 = vsel %vm75_vm1, %v71_v23, %v62_v12  ;;  %v80_v32 = vsel %vm76_vm2, %v72_v24, %v63_v13  ;;  %v81_v33 = vsel %vm77_vm3, %v73_v25, %v64_v15  ;;  %v94_v34 = vand.u32 2147483647, %v90_v26 }
  0x1e   :  { %vm95_vm4 = vcmp.lt.f32.partialorder %v91_v27, %v78_v30  ;;  %vm96_vm5 = vcmp.lt.f32.partialorder %v92_v28, %v79_v31  ;;  %vm97_vm6 = vcmp.lt.f32.partialorder %v93_v29, %v80_v32  ;;  %v107_v35 = vstv %s410_s24 }
  0x1f   :  { %v82_v37 = vsel %vm74_vm0, 1, %v366_v36  ;;  %v83_v38 = vsel %vm75_vm1, 1, %v366_v36  ;;  %v84_v39 = vsel %vm76_vm2, 1, %v366_v36  ;;  %vm98_vm7 = vcmp.lt.f32.partialorder %v94_v34, %v81_v33 }
  0x20   :  { %v85_v40 = vsel %vm77_vm3, 1, %v366_v36  ;;  %v99_v41 = vsel %vm95_vm4, %v91_v27, %v78_v30  ;;  %v100_v42 = vsel %vm96_vm5, %v92_v28, %v79_v31  ;;  %v101_v43 = vsel %vm97_vm6, %v93_v29, %v80_v32 }
  0x21   :  { %v102_v44 = vsel %vm98_vm7, %v94_v34, %v81_v33  ;;  %v108_v45 = vsub.f32 %v398_v0, %v107_v35  ;;  %v109_v46 = vsub.f32 %v400_v1, %v107_v35  ;;  %v110_v47 = vsub.f32 %v402_v2, %v107_v35 }
  0x22   :  { %v103_v48 = vsel %vm95_vm4, 2, %v82_v37  ;;  %v104_v49 = vsel %vm96_vm5, 2, %v83_v38  ;;  %v111_v50 = vsub.f32 %v404_v3, %v107_v35  ;;  %v128_v51 = vstv %s416_s25 }
  0x23   :  { %v112_v52 = vand.u32 2147483647, %v108_v45  ;;  %v113_v53 = vand.u32 2147483647, %v109_v46  ;;  %v114_v54 = vand.u32 2147483647, %v110_v47  ;;  %v129_v55 = vsub.f32 %v398_v0, %v128_v51 }
  0x24   :  { %v115_v56 = vand.u32 2147483647, %v111_v50  ;;  %v130_v57 = vsub.f32 %v400_v1, %v128_v51  ;;  %v131_v58 = vsub.f32 %v402_v2, %v128_v51  ;;  %v132_v59 = vsub.f32 %v404_v3, %v128_v51 }
  0x25   :  { %vm116_vm8 = vcmp.lt.f32.partialorder %v112_v52, %v99_v41  ;;  %vm117_vm9 = vcmp.lt.f32.partialorder %v113_v53, %v100_v42  ;;  %vm118_vm10 = vcmp.lt.f32.partialorder %v114_v54, %v101_v43  ;;  %v133_v60 = vand.u32 2147483647, %v129_v55 }
  0x26   :  { %v105_v61 = vsel %vm97_vm6, 2, %v84_v39  ;;  %vm119_vm11 = vcmp.lt.f32.partialorder %v115_v56, %v102_v44  ;;  %v120_v62 = vsel %vm116_vm8, %v112_v52, %v99_v41  ;;  %v149_v63 = vstv %s426_s26 }
  0x27   :  { %v106_v4 = vsel %vm98_vm7, 2, %v85_v40  ;;  %v121_v5 = vsel %vm117_vm9, %v113_v53, %v100_v42  ;;  %v122_v6 = vsel %vm118_vm10, %v114_v54, %v101_v43  ;;  %v170_v7 = vstv %s429_s27 }
  0x28   :  { %v123_v8 = vsel %vm119_vm11, %v115_v56, %v102_v44  ;;  %v134_v9 = vand.u32 2147483647, %v130_v57  ;;  %v135_v10 = vand.u32 2147483647, %v131_v58  ;;  %vm137_vm12 = vcmp.lt.f32.partialorder %v133_v60, %v120_v62 }
  0x29   :  { %v124_v11 = vsel %vm116_vm8, 3, %v103_v48  ;;  %v125_v12 = vsel %vm117_vm9, 3, %v104_v49  ;;  %v136_v13 = vand.u32 2147483647, %v132_v59  ;;  %v150_v14 = vsub.f32 %v398_v0, %v149_v63 }
  0x2a   :  { %vm138_vm13 = vcmp.lt.f32.partialorder %v134_v9, %v121_v5  ;;  %vm139_vm14 = vcmp.lt.f32.partialorder %v135_v10, %v122_v6  ;;  %v151_v15 = vsub.f32 %v400_v1, %v149_v63  ;;  %v152_v16 = vsub.f32 %v402_v2, %v149_v63 }
  0x2b   :  { %v126_v17 = vsel %vm118_vm10, 3, %v105_v61  ;;  %v127_v18 = vsel %vm119_vm11, 3, %v106_v4  ;;  %vm140_vm15 = vcmp.lt.f32.partialorder %v136_v13, %v123_v8  ;;  %v141_v19 = vsel %vm137_vm12, %v133_v60, %v120_v62 }
  0x2c   :  { %v142_v20 = vsel %vm138_vm13, %v134_v9, %v121_v5  ;;  %v143_v21 = vsel %vm139_vm14, %v135_v10, %v122_v6  ;;  %v144_v22 = vsel %vm140_vm15, %v136_v13, %v123_v8  ;;  %v153_v23 = vsub.f32 %v404_v3, %v149_v63 }
  0x2d   :  { %v154_v24 = vand.u32 2147483647, %v150_v14  ;;  %v155_v25 = vand.u32 2147483647, %v151_v15  ;;  %v156_v26 = vand.u32 2147483647, %v152_v16  ;;  %v171_v27 = vsub.f32 %v398_v0, %v170_v7 }
  0x2e   :  { %v157_v28 = vand.u32 2147483647, %v153_v23  ;;  %v172_v29 = vsub.f32 %v400_v1, %v170_v7  ;;  %v173_v30 = vsub.f32 %v402_v2, %v170_v7  ;;  %v174_v31 = vsub.f32 %v404_v3, %v170_v7 }
  0x2f   :  { %vm158_vm0 = vcmp.lt.f32.partialorder %v154_v24, %v141_v19  ;;  %vm159_vm1 = vcmp.lt.f32.partialorder %v155_v25, %v142_v20  ;;  %vm160_vm2 = vcmp.lt.f32.partialorder %v156_v26, %v143_v21  ;;  %v175_v32 = vand.u32 2147483647, %v171_v27 }
  0x30   :  { %v145_v33 = vsel %vm137_vm12, 4, %v124_v11  ;;  %v146_v34 = vsel %vm138_vm13, 4, %v125_v12  ;;  %vm161_vm3 = vcmp.lt.f32.partialorder %v157_v28, %v144_v22  ;;  %v162_v35 = vsel %vm158_vm0, %v154_v24, %v141_v19 }
  0x31   :  { %v147_v36 = vsel %vm139_vm14, 4, %v126_v17  ;;  %v148_v37 = vsel %vm140_vm15, 4, %v127_v18  ;;  %v163_v38 = vsel %vm159_vm1, %v155_v25, %v142_v20  ;;  %v164_v39 = vsel %vm160_vm2, %v156_v26, %v143_v21 }
  0x32   :  { %v165_v40 = vsel %vm161_vm3, %v157_v28, %v144_v22  ;;  %v176_v41 = vand.u32 2147483647, %v172_v29  ;;  %v177_v42 = vand.u32 2147483647, %v173_v30  ;;  %vm179_vm4 = vcmp.lt.f32.partialorder %v175_v32, %v162_v35 }
  0x33   :  { %v166_v43 = vsel %vm158_vm0, 5, %v145_v33  ;;  %v167_v44 = vsel %vm159_vm1, 5, %v146_v34  ;;  %v178_v45 = vand.u32 2147483647, %v174_v31  ;;  %v191_v46 = vstv %s463_s28 }
  0x34   :  { %vm180_vm5 = vcmp.lt.f32.partialorder %v176_v41, %v163_v38  ;;  %vm181_vm6 = vcmp.lt.f32.partialorder %v177_v42, %v164_v39  ;;  %v192_v47 = vsub.f32 %v398_v0, %v191_v46  ;;  %v193_v48 = vsub.f32 %v400_v1, %v191_v46 }
  0x35   :  { %v168_v49 = vsel %vm160_vm2, 5, %v147_v36  ;;  %v169_v50 = vsel %vm161_vm3, 5, %v148_v37  ;;  %vm182_vm7 = vcmp.lt.f32.partialorder %v178_v45, %v165_v40  ;;  %v183_v51 = vsel %vm179_vm4, %v175_v32, %v162_v35 }
  0x36   :  { %v184_v52 = vsel %vm180_vm5, %v176_v41, %v163_v38  ;;  %v185_v53 = vsel %vm181_vm6, %v177_v42, %v164_v39  ;;  %v187_v54 = vsel %vm179_vm4, 6, %v166_v43  ;;  %v194_v55 = vsub.f32 %v402_v2, %v191_v46 }
  0x37   :  { %v188_v56 = vsel %vm180_vm5, 6, %v167_v44  ;;  %v195_v57 = vsub.f32 %v404_v3, %v191_v46  ;;  %v196_v58 = vand.u32 2147483647, %v192_v47  ;;  %v197_v59 = vand.u32 2147483647, %v193_v48 }
  0x38   :  { %v186_v0 = vsel %vm182_vm7, %v178_v45, %v165_v40  ;;  %v189_v1 = vsel %vm181_vm6, 6, %v168_v49  ;;  %v198_v60 = vand.u32 2147483647, %v194_v55  ;;  %v190_v61 = vsel %vm182_vm7, 6, %v169_v50 }
  0x39   :  { %v199_v62 = vand.u32 2147483647, %v195_v57  ;;  %vm200_vm8 = vcmp.lt.f32.partialorder %v196_v58, %v183_v51  ;;  %vm201_vm9 = vcmp.lt.f32.partialorder %v197_v59, %v184_v52 }
  0x3a   :  { %vm202_vm10 = vcmp.lt.f32.partialorder %v198_v60, %v185_v53  ;;  %v208_v2 = vsel %vm200_vm8, 7, %v187_v54  ;;  %v209_v3 = vsel %vm201_vm9, 7, %v188_v56  ;;  %v204_v63 = vsel %vm200_vm8, %v196_v58, %v183_v51 }
  0x3b   :  { %vm203_vm11 = vcmp.lt.f32.partialorder %v199_v62, %v186_v0  ;;  %v210_v4 = vsel %vm202_vm10, 7, %v189_v1  ;;  %v212_v5 = vpack.c.b16 %v209_v3, %v208_v2  ;;  %216 = vst [vmem:[#allocation8] sm:$0xff] %v204_v63  ;;  %v205_v6 = vsel %vm201_vm9, %v197_v59, %v184_v52 }
  0x3c   :  { %v211_v7 = vsel %vm203_vm11, 7, %v190_v61  ;;  %217 = vst [vmem:[#allocation8 + $0x8] sm:$0xff] %v205_v6  ;;  %v206_v8 = vsel %vm202_vm10, %v198_v60, %v185_v53  ;;  %v207_v9 = vsel %vm203_vm11, %v199_v62, %v186_v0 }
  0x3d   :  { %v213_v10 = vpack.c.b16 %v211_v7, %v210_v4  ;;  %218 = vst [vmem:[#allocation8 + $0x10] sm:$0xff] %v206_v8 }
  0x3e   :  { %219 = vst [vmem:[#allocation8 + $0x18] sm:$0xff] %v207_v9 }
  0x3f   :  { %v214_v11 = vpack.c.b8 %v213_v10, %v212_v5  ;;  %243 = dma.vmem_to_hbm [thread:$0]  %s236_s30, 512, %s238_s6, [#allocation9], %s364_s21, %s364_s21, %s365_s22  }
  0x41   :  { %215 = vst [vmem:[#allocation7] sm:$0xff] %v214_v11 }
  0x42   :  { %230 = dma.vmem_to_hbm [thread:$0]  %s226_s8, 128, %s228_s11, [#allocation4]  }
  0x43   :  { %358 = dma.done.wait [#allocation4], 128  }
  0x44   :  { %359 = vsyncadd [#allocation4], 4294967168 }
  0x45   :  { %360 = dma.done.wait [#allocation9], 512  }
  0x46   :  { %361 = vsyncadd [#allocation9], 4294966784 }
  0x47   :  { %252 = vsyncpa [#allocation3], 1 }
  0x48   :  { %253 = vsyncpa [#allocation4], 1 }
  0x49   :  { %254 = vsyncpa [#allocation9], 1 }
  0x4a   :  { %255 = vsyncpa [#allocation5], 1 }

</bundles_post_ra>
